<compile_context>
chip_gen: v7x
topology: tpu7x:2x2x1
jax: 0.10.0
libtpu: 0.0.40
codegen_flags: <defaults>
</compile_context>

<pallas_src>
import functools

import jax
import jax.numpy as jnp
from jax.experimental import pallas as pl
from jax.experimental.pallas import tpu as pltpu

KH = KW = 3  # 3x3 convs, stride 1, SAME padding


def _resblock_kernel(xflat_ref, w_ref, b_ref, out_ref, *, Wp):
    """All images of the block in one step, lane-dense flat-spatial layout.

    xflat_ref : (n_img, Cp, L_pad)    channel-padded, spatially padded, flattened input
                                      (L_pad is a multiple of 128, zero-filled tail)
    w_ref     : (Cp, 9*Cp)            branch-summed conv weights, matmul-ready
    b_ref     : (Cp, 1)               branch-summed conv bias
    out_ref   : (n_img, Cp, HWp_pad)  output in flat (h*Wp + w) layout, 128-multiple lanes
    """
    n_img, Cp, HWp_pad = out_ref.shape
    L_pad = xflat_ref.shape[-1]

    w = w_ref[...]                                        # (Cp, 9*Cp), loaded once
    bias = jnp.broadcast_to(b_ref[...], (Cp, HWp_pad))    # hoisted out of the image loop

    for n in range(n_img):
        # One aligned full-row load per image; all tap shifts are XLU rolls in-register.
        xf = xflat_ref[n]                                 # (Cp, L_pad)
        taps = []
        for kh in range(KH):
            for kw in range(KW):
                start = kh * Wp + kw
                t = xf if start == 0 else pltpu.roll(xf, shift=L_pad - start, axis=1)
                taps.append(t[:, :HWp_pad])
        # In-register im2col: (9*Cp, HWp_pad); no VMEM scratch round-trip.
        patches = jnp.concatenate(taps, axis=0)

        # All conv branches fused into one MXU matmul: (Cp, 9Cp) @ (9Cp, HWp_pad).
        conv = jnp.dot(w, patches, preferred_element_type=jnp.float32)

        # Identity branch == the centre tap (kh=1, kw=1); bias added once.
        out_ref[n] = (taps[4] + conv + bias).astype(out_ref.dtype)


def residual_block(x_nchw, weights, biases, *, images_per_step=None):
    """ResidualBlock forward: identity + sum of 3x3 conv branches.

    x_nchw  : (N, C, H, W)
    weights : (NB, 3, 3, C, C)  HWIO per branch
    biases  : (NB, C)
    """
    N, C, H, W = x_nchw.shape
    NB = weights.shape[0]
    assert weights.shape == (NB, KH, KW, C, C) and biases.shape == (NB, C)

    Cp = ((C + 7) // 8) * 8              # pad channels up to the sublane tile (8)
    Hp, Wp = H + 2, W + 2                # SAME padding for 3x3
    HWp = H * Wp                         # flat output length (stride Wp per row)
    HWp_pad = ((HWp + 127) // 128) * 128 # lane-dense output width (multiple of 128)
    L_pad = max(((Hp * Wp + 127) // 128) * 128, HWp_pad)  # flat padded-input width

    if images_per_step is None:
        images_per_step = N              # whole batch per step: per-step work << step overhead
    assert N % images_per_step == 0
    steps = N // images_per_step

    x = x_nchw.astype(jnp.float32)
    # Stay in NCHW: pad channels to Cp, pad spatially, flatten (Hp, Wp) onto the lane
    # axis, then zero-pad the flat axis up to the 128-multiple L_pad.
    xpad = jnp.pad(x, ((0, 0), (0, Cp - C), (1, 1), (1, 1)))              # (N, Cp, Hp, Wp)
    xflat = jnp.pad(xpad.reshape(N, Cp, Hp * Wp),
                    ((0, 0), (0, 0), (0, L_pad - Hp * Wp)))               # (N, Cp, L_pad)

    # Fuse the linear conv branches: sum weights / biases across branches.
    # TODO(synk): only valid while branches are plain Conv2d summed by a float add; revisit
    #             if a QuantEltwiseAdd fake-quant or nonlinearity is inserted per-branch.
    w_sum = weights.sum(0).astype(jnp.float32)                            # (3, 3, C, C)
    w_sum = jnp.pad(w_sum, ((0, 0), (0, 0), (0, Cp - C), (0, Cp - C)))    # (3, 3, Cp, Cp)
    w_mat = jnp.transpose(w_sum.reshape(KH * KW * Cp, Cp))                # (Cp, 9*Cp)
    b_sum = biases.sum(0).astype(jnp.float32)
    b_mat = jnp.pad(b_sum, (0, Cp - C)).reshape(Cp, 1)                    # (Cp, 1)

    kernel = functools.partial(_resblock_kernel, Wp=Wp)

    out_flat = pl.pallas_call(
        kernel,
        out_shape=jax.ShapeDtypeStruct((N, Cp, HWp_pad), jnp.float32),
        grid_spec=pltpu.PrefetchScalarGridSpec(
            num_scalar_prefetch=0,
            grid=(steps,),
            in_specs=[
                pl.BlockSpec((images_per_step, Cp, L_pad), lambda i: (i, 0, 0)),
                pl.BlockSpec((Cp, KH * KW * Cp), lambda i: (0, 0)),
                pl.BlockSpec((Cp, 1), lambda i: (0, 0)),
            ],
            out_specs=pl.BlockSpec((images_per_step, Cp, HWp_pad), lambda i: (i, 0, 0)),
        ),
        compiler_params=pltpu.CompilerParams(
            dimension_semantics=("parallel",),   # batch-tile axis; v7x TCs split it when steps >= 2
        ),
    )(xflat, w_mat, b_mat)

    # Drop channel padding, lane padding, and the per-row padded-stride garbage columns.
    out = out_flat[:, :C, :HWp].reshape(N, C, H, Wp)[:, :, :, :W]
    return out


def _reference(x_nchw, weights, biases):
    """Pure-JAX reference (identity + sum of convs), for correctness check."""
    x = jnp.transpose(x_nchw, (0, 2, 3, 1)).astype(jnp.float32)
    out = x
    for b in range(weights.shape[0]):
        conv = jax.lax.conv_general_dilated(
            x, weights[b], window_strides=(1, 1), padding="SAME",
            dimension_numbers=("NHWC", "HWIO", "NHWC"),
        ) + biases[b]
        out = out + conv
    return jnp.transpose(out, (0, 3, 1, 2))


if __name__ == "__main__":
    key = jax.random.PRNGKey(0)
    N, C, H, W = 2, 4, 16, 16      # in_channels = out_channels = 4
    NUM_CONV_BRANCHES = 2          # total branches = identity + 2 convs

    k_x, k_w, k_b = jax.random.split(key, 3)
    x = jax.random.normal(k_x, (N, C, H, W), dtype=jnp.float32)
    weights = jax.random.normal(
        k_w, (NUM_CONV_BRANCHES, KH, KW, C, C), dtype=jnp.float32
    ) * (1.0 / (KH * KW * C)) ** 0.5
    biases = jax.random.normal(k_b, (NUM_CONV_BRANCHES, C), dtype=jnp.float32) * 0.1

    run = jax.jit(residual_block)
    out = jax.block_until_ready(run(x, weights, biases))
    ref = jax.block_until_ready(_reference(x, weights, biases))

    assert out.shape == (N, C, H, W)
    assert jnp.allclose(out, ref, atol=1e-4, rtol=1e-4), "mismatch vs JAX reference"
    print("KERNEL_OK")
</pallas_src>

<mosaic_0001>
module attributes {stable_mosaic.version = 11 : i64} {
  func.func @_resblock_kernel(%arg0: i32, %arg1: memref<2x8x384xf32, #tpu.memory_space<vmem>>, %arg2: memref<8x72xf32, #tpu.memory_space<vmem>>, %arg3: memref<8x1xf32, #tpu.memory_space<vmem>>, %arg4: memref<2x8x384xf32, #tpu.memory_space<vmem>>) attributes {dimension_semantics = [#tpu.dimension_semantics<parallel>], iteration_bounds = array<i64: 1>, scalar_prefetch = 0 : i64, scratch_operands = 0 : i64, tpu.core_type = #tpu.core_type<tc>, window_params = [{transform_indices = @transform_0, window_bounds = array<i64: 2, 8, 384>}, {pipeline_mode = #tpu.pipeline_mode<synchronous>, transform_indices = @transform_1, window_bounds = array<i64: 8, 72>}, {pipeline_mode = #tpu.pipeline_mode<synchronous>, transform_indices = @transform_2, window_bounds = array<i64: 8, 1>}, {transform_indices = @transform_3, window_bounds = array<i64: 2, 8, 384>}]} {
    %c0 = arith.constant 0 : index
    %c0_0 = arith.constant 0 : index
    %0 = vector.load %arg2[%c0, %c0_0] : memref<8x72xf32, #tpu.memory_space<vmem>>, vector<8x72xf32>
    %c0_1 = arith.constant 0 : index
    %c0_2 = arith.constant 0 : index
    %1 = vector.load %arg3[%c0_1, %c0_2] : memref<8x1xf32, #tpu.memory_space<vmem>>, vector<8x1xf32>
    %2 = vector.shape_cast %1 : vector<8x1xf32> to vector<8x1xf32>
    %3 = vector.broadcast %2 : vector<8x1xf32> to vector<8x384xf32>
    %c0_3 = arith.constant 0 : index
    %c0_4 = arith.constant 0 : index
    %c0_5 = arith.constant 0 : index
    %4 = vector.load %arg1[%c0_3, %c0_4, %c0_5] : memref<2x8x384xf32, #tpu.memory_space<vmem>>, vector<1x8x384xf32>
    %5 = vector.shape_cast %4 : vector<1x8x384xf32> to vector<8x384xf32>
    %c383_i32 = arith.constant 383 : i32
    %6 = tpu.dynamic_rotate %5 by %c383_i32 dim 1 : vector<8x384xf32>, i32 -> vector<8x384xf32>
    %c382_i32 = arith.constant 382 : i32
    %7 = tpu.dynamic_rotate %5 by %c382_i32 dim 1 : vector<8x384xf32>, i32 -> vector<8x384xf32>
    %c366_i32 = arith.constant 366 : i32
    %8 = tpu.dynamic_rotate %5 by %c366_i32 dim 1 : vector<8x384xf32>, i32 -> vector<8x384xf32>
    %c365_i32 = arith.constant 365 : i32
    %9 = tpu.dynamic_rotate %5 by %c365_i32 dim 1 : vector<8x384xf32>, i32 -> vector<8x384xf32>
    %c364_i32 = arith.constant 364 : i32
    %10 = tpu.dynamic_rotate %5 by %c364_i32 dim 1 : vector<8x384xf32>, i32 -> vector<8x384xf32>
    %c348_i32 = arith.constant 348 : i32
    %11 = tpu.dynamic_rotate %5 by %c348_i32 dim 1 : vector<8x384xf32>, i32 -> vector<8x384xf32>
    %c347_i32 = arith.constant 347 : i32
    %12 = tpu.dynamic_rotate %5 by %c347_i32 dim 1 : vector<8x384xf32>, i32 -> vector<8x384xf32>
    %c346_i32 = arith.constant 346 : i32
    %13 = tpu.dynamic_rotate %5 by %c346_i32 dim 1 : vector<8x384xf32>, i32 -> vector<8x384xf32>
    %14 = tpu.concatenate %5, %6, %7, %8, %9, %10, %11, %12, %13 in 0 : vector<8x384xf32>, vector<8x384xf32>, vector<8x384xf32>, vector<8x384xf32>, vector<8x384xf32>, vector<8x384xf32>, vector<8x384xf32>, vector<8x384xf32>, vector<8x384xf32> -> vector<72x384xf32>
    %cst = arith.constant dense<0.000000e+00> : vector<8x384xf32>
    %15 = tpu.matmul %0, %14, %cst {dimension_numbers = #tpu.dot_dimension_numbers<[1], [0], [0], [1], [0, 0, 1, 1], [], []>} : vector<8x72xf32>, vector<72x384xf32>, vector<8x384xf32> -> vector<8x384xf32>
    %16 = arith.addf %9, %15 : vector<8x384xf32>
    %17 = arith.addf %16, %3 : vector<8x384xf32>
    %c0_6 = arith.constant 0 : index
    %c0_7 = arith.constant 0 : index
    %c0_8 = arith.constant 0 : index
    %18 = vector.load %arg4[%c0_6, %c0_7, %c0_8] : memref<2x8x384xf32, #tpu.memory_space<vmem>>, vector<1x8x384xf32>
    %19 = vector.shape_cast %18 : vector<1x8x384xf32> to vector<8x384xf32>
    %20 = vector.shape_cast %17 : vector<8x384xf32> to vector<1x8x384xf32>
    tpu.vector_store %arg4[%c0_6, %c0_7, %c0_8], %20 {strides = array<i32>} : memref<2x8x384xf32, #tpu.memory_space<vmem>>, vector<1x8x384xf32>,
    %c1 = arith.constant 1 : index
    %c0_9 = arith.constant 0 : index
    %c0_10 = arith.constant 0 : index
    %21 = vector.load %arg1[%c1, %c0_9, %c0_10] : memref<2x8x384xf32, #tpu.memory_space<vmem>>, vector<1x8x384xf32>
    %22 = vector.shape_cast %21 : vector<1x8x384xf32> to vector<8x384xf32>
    %c383_i32_11 = arith.constant 383 : i32
    %23 = tpu.dynamic_rotate %22 by %c383_i32_11 dim 1 : vector<8x384xf32>, i32 -> vector<8x384xf32>
    %c382_i32_12 = arith.constant 382 : i32
    %24 = tpu.dynamic_rotate %22 by %c382_i32_12 dim 1 : vector<8x384xf32>, i32 -> vector<8x384xf32>
    %c366_i32_13 = arith.constant 366 : i32
    %25 = tpu.dynamic_rotate %22 by %c366_i32_13 dim 1 : vector<8x384xf32>, i32 -> vector<8x384xf32>
    %c365_i32_14 = arith.constant 365 : i32
    %26 = tpu.dynamic_rotate %22 by %c365_i32_14 dim 1 : vector<8x384xf32>, i32 -> vector<8x384xf32>
    %c364_i32_15 = arith.constant 364 : i32
    %27 = tpu.dynamic_rotate %22 by %c364_i32_15 dim 1 : vector<8x384xf32>, i32 -> vector<8x384xf32>
    %c348_i32_16 = arith.constant 348 : i32
    %28 = tpu.dynamic_rotate %22 by %c348_i32_16 dim 1 : vector<8x384xf32>, i32 -> vector<8x384xf32>
    %c347_i32_17 = arith.constant 347 : i32
    %29 = tpu.dynamic_rotate %22 by %c347_i32_17 dim 1 : vector<8x384xf32>, i32 -> vector<8x384xf32>
    %c346_i32_18 = arith.constant 346 : i32
    %30 = tpu.dynamic_rotate %22 by %c346_i32_18 dim 1 : vector<8x384xf32>, i32 -> vector<8x384xf32>
    %31 = tpu.concatenate %22, %23, %24, %25, %26, %27, %28, %29, %30 in 0 : vector<8x384xf32>, vector<8x384xf32>, vector<8x384xf32>, vector<8x384xf32>, vector<8x384xf32>, vector<8x384xf32>, vector<8x384xf32>, vector<8x384xf32>, vector<8x384xf32> -> vector<72x384xf32>
    %cst_19 = arith.constant dense<0.000000e+00> : vector<8x384xf32>
    %32 = tpu.matmul %0, %31, %cst_19 {dimension_numbers = #tpu.dot_dimension_numbers<[1], [0], [0], [1], [0, 0, 1, 1], [], []>} : vector<8x72xf32>, vector<72x384xf32>, vector<8x384xf32> -> vector<8x384xf32>
    %33 = arith.addf %26, %32 : vector<8x384xf32>
    %34 = arith.addf %33, %3 : vector<8x384xf32>
    %c1_20 = arith.constant 1 : index
    %c0_21 = arith.constant 0 : index
    %c0_22 = arith.constant 0 : index
    %35 = vector.load %arg4[%c1_20, %c0_21, %c0_22] : memref<2x8x384xf32, #tpu.memory_space<vmem>>, vector<1x8x384xf32>
    %36 = vector.shape_cast %35 : vector<1x8x384xf32> to vector<8x384xf32>
    %37 = vector.shape_cast %34 : vector<8x384xf32> to vector<1x8x384xf32>
    tpu.vector_store %arg4[%c1_20, %c0_21, %c0_22], %37 {strides = array<i32>} : memref<2x8x384xf32, #tpu.memory_space<vmem>>, vector<1x8x384xf32>,
    return
  }
  func.func @transform_0(%arg0: i32) -> (i32, i32, i32) {
    %c0_i32 = arith.constant 0 : i32
    %c0_i32_0 = arith.constant 0 : i32
    %c0_i32_1 = arith.constant 0 : i32
    return %arg0, %c0_i32, %c0_i32_0 : i32, i32, i32
  }
  func.func @transform_1(%arg0: i32) -> (i32, i32) {
    %c0_i32 = arith.constant 0 : i32
    %c0_i32_0 = arith.constant 0 : i32
    %c0_i32_1 = arith.constant 0 : i32
    return %c0_i32, %c0_i32_0 : i32, i32
  }
  func.func @transform_2(%arg0: i32) -> (i32, i32) {
    %c0_i32 = arith.constant 0 : i32
    %c0_i32_0 = arith.constant 0 : i32
    %c0_i32_1 = arith.constant 0 : i32
    return %c0_i32, %c0_i32_0 : i32, i32
  }
  func.func @transform_3(%arg0: i32) -> (i32, i32, i32) {
    %c0_i32 = arith.constant 0 : i32
    %c0_i32_0 = arith.constant 0 : i32
    %c0_i32_1 = arith.constant 0 : i32
    return %arg0, %c0_i32, %c0_i32_0 : i32, i32, i32
  }
}

</mosaic_0001>

<bundles_post_ra>
// kernel: residual_block.1
= control target key start
LH: loop header
LB: loop body
LE: loop exit
PB: predicated region body
PF: predicated region fallthrough
CT: control target
= control target key end

     0   :  { %v708_v3 = vmov 0.0|0.0   ;;  %s709_s20 = smov 126   ;;  %s710_s21 = smov 127   ;;  %v716_v9 = vmov 0.0   ;;  %vm717_vm0 = vmmov 0   ;;  %v719_v12 = vmov 0   ;;  %s1002_s0 = inlined_call_operand.vmem [shape: f32[2,8,384], index: 0, kind: input, shape index: {}]   ;;  %s1003_s2 = inlined_call_operand.vmem [shape: f32[8,1], index: 2, kind: input, shape index: {}]   ;;  %s1004_s1 = inlined_call_operand.vmem [shape: f32[8,72], index: 1, kind: input, shape index: {}]   ;;  %s1005_s3 = inlined_call_operand.vmem [shape: f32[2,8,384], index: 3, kind: output, shape index: {}]  }
   0x1   :  { %v743_v0 = vld [vmem:[%s1002_s0 + $0x8] sm:$0xff]  ;;  %v748_v1 = vld [vmem:[%s1002_s0 + $0x10] sm:$0xff]  ;;  %v753_v2 = vld [vmem:[%s1002_s0] sm:$0xff]  ;;  %579 = vmatprep.subr.bf16.mxu1 %v708_v3  ;;  %s711_s22 = smov 110   ;;  %s712_s23 = smov 109   ;;  %174 = vmatprep.mubr.f32.mxu0 %v716_v9  ;;  %v30_v14 = vlaneseq  ;;  %vm106_vm9 = vcmask 588800  }
   0x2   :  { %v641_v4 = vpack.i.bf16 %v748_v1, %v743_v0  ;;  %v761_v5 = vld [vmem:[%s1002_s0 + $0x20] sm:$0xff]  ;;  %s713_s24 = smov 108   ;;  %s714_s25 = smov 92   ;;  %v782_v7 = vld [vmem:[%s1002_s0 + $0x18] sm:$0xff]  ;;  %v787_v8 = vld [vmem:[%s1002_s0 + $0x28] sm:$0xff]  ;;  %539 = vmatprep.mubr.msk.f32.mxu1 %vm717_vm0, %v716_v9  ;;  %706 = vset.pattern.permute.xlu1 %v719_v12 }
   0x3   :  { %v636_v6 = vpack.i.bf16 %v761_v5, %v753_v2  ;;  %s715_s26 = smov 91   ;;  %s718_s4 = smov 90   ;;  %v676_v10 = vpack.i.bf16 %v782_v7, %v787_v8  ;;  %v691_v11 = vpack.i.bf16 %v787_v8, %v761_v5  ;;  %707 = vset.pattern.permute.xlu0 %v719_v12  ;;  %v15_v13 = vld [vmem:[%s1003_s2] sm:$0xff]  ;;  %v819_v15 = vand.u32 127, %v30_v14 }
   0x4   :  { %642 = vrot.lane.b32.xlu1 %v641_v4, %s709_s20  ;;  %632 = vrot.lane.b32.xlu0 %v641_v4, %s710_s21 }
   0x5   :  { %vm32_vm1 = vcmp.lt.s32.totalorder %v819_v15, 127  ;;  %vm42_vm2 = vcmp.lt.s32.totalorder %v819_v15, 126  ;;  %vm52_vm3 = vcmp.lt.s32.totalorder %v819_v15, 110  ;;  %vm62_vm4 = vcmp.lt.s32.totalorder %v819_v15, 109 }
   0x6   :  { %vm72_vm5 = vcmp.lt.s32.totalorder %v819_v15, 108  ;;  %vm82_vm6 = vcmp.lt.s32.totalorder %v819_v15, 92  ;;  %vm92_vm7 = vcmp.lt.s32.totalorder %v819_v15, 91  ;;  %vm102_vm8 = vcmp.lt.s32.totalorder %v819_v15, 90 }
   0x8   :  { %647 = vrot.lane.b32.xlu1 %v641_v4, %s711_s22  ;;  %637 = vrot.lane.b32.xlu0 %v636_v6, %s710_s21 }
   0xc   :  { %657 = vrot.lane.b32.xlu1 %v636_v6, %s711_s22  ;;  %652 = vrot.lane.b32.xlu0 %v636_v6, %s709_s20 }
  0x10   :  { %60 = vrot.lane.b32.xlu1 %v748_v1, %s712_s23  ;;  %58 = vrot.lane.b32.xlu0 %v743_v0, %s712_s23 }
  0x14   :  { %56 = vrot.lane.b32.xlu1 %v753_v2, %s712_s23  ;;  %662 = vrot.lane.b32.xlu0 %v641_v4, %s713_s24 }
  0x18   :  { %667 = vrot.lane.b32.xlu1 %v641_v4, %s714_s25  ;;  %66 = vrot.lane.b32.xlu0 %v753_v2, %s713_s24 }
  0x1c   :  { %76 = vrot.lane.b32.xlu1 %v753_v2, %s714_s25  ;;  %672 = vrot.lane.b32.xlu0 %v641_v4, %s715_s26 }
  0x20   :  { %98 = vrot.lane.b32.xlu1 %v743_v0, %s718_s4  ;;  %86 = vrot.lane.b32.xlu0 %v753_v2, %s715_s26 }
  0x24   :  { %677 = vrot.lane.b32.xlu1 %v676_v10, %s710_s21  ;;  %100 = vrot.lane.b32.xlu0 %v748_v1, %s718_s4 }
  0x28   :  { %682 = vrot.lane.b32.xlu1 %v676_v10, %s709_s20  ;;  %96 = vrot.lane.b32.xlu0 %v753_v2, %s718_s4 }
  0x2c   :  { %293 = vrot.lane.b32.xlu1 %v761_v5, %s712_s23  ;;  %687 = vrot.lane.b32.xlu0 %v676_v10, %s711_s22 }
  0x30   :  { %692 = vrot.lane.b32.xlu1 %v691_v11, %s713_s24  ;;  %295 = vrot.lane.b32.xlu0 %v787_v8, %s712_s23 }
  0x34   :  { %300 = vrot.lane.b32.xlu1 %v782_v7, %s713_s24  ;;  %291 = vrot.lane.b32.xlu0 %v782_v7, %s712_s23 }
  0x38   :  { %702 = vrot.lane.b32.xlu1 %v691_v11, %s715_s26  ;;  %697 = vrot.lane.b32.xlu0 %v691_v11, %s714_s25 }
  0x3c   :  { %318 = vrot.lane.b32.xlu1 %v782_v7, %s715_s26  ;;  %309 = vrot.lane.b32.xlu0 %v782_v7, %s714_s25 }
  0x40   :  { %331 = vrot.lane.b32.xlu1 %v787_v8, %s718_s4  ;;  %329 = vrot.lane.b32.xlu0 %v761_v5, %s718_s4 }
  0x44   :  { %327 = vrot.lane.b32.xlu0 %v782_v7, %s718_s4  ;;  %18 = vperm.xlu1 %706, %v15_v13  }
  0x76   :  { %v643_v16 = vpop.permute.xlu1 %642  ;;  %v633_v17 = vpop.permute.xlu0 %632 }
  0x77   :  { %v635_v18 = vunpack.i.h.bf16 %v633_v17  ;;  %v634_v19 = vunpack.i.l.bf16 %v633_v17  ;;  %v645_v20 = vunpack.i.h.bf16 %v643_v16  ;;  %v644_v21 = vunpack.i.l.bf16 %v643_v16 }
  0x79   :  { %v33_v22 = vsel %vm32_vm1, %v634_v19, %v635_v18  ;;  %v43_v31 = vsel %vm42_vm2, %v644_v21, %v645_v20 }
  0x7a   :  { %v648_v23 = vpop.permute.xlu1 %647  ;;  %v824_v24 = vpop.permute.xlu0 %637  ;;  %v563_v25 = vpack.c.bf16 %v33_v22, %v743_v0 }
  0x7b   :  { %v650_v26 = vunpack.i.h.bf16 %v648_v23  ;;  %v649_v27 = vunpack.i.l.bf16 %v648_v23  ;;  %v639_v28 = vunpack.i.l.bf16 %v824_v24 }
  0x7c   :  { %564 = vmatprep.subr.bf16.mxu0 %v563_v25  ;;  %v640_v25 = vunpack.i.h.bf16 %v824_v24  ;;  %v908_v24 = vld [vmem:[%s1004_s1] sm:$0xff] }
  0x7d   :  { %v34_v29 = vsel %vm32_vm1, %v639_v28, %v634_v19  ;;  %v35_v30 = vsel %vm32_vm1, %v635_v18, %v639_v28  ;;  %v53_v32 = vsel %vm52_vm3, %v649_v27, %v650_v26 }
  0x7e   :  { %v838_v33 = vpop.permute.xlu1 %657  ;;  %v840_v34 = vpop.permute.xlu0 %652  ;;  %v565_v35 = vpack.c.bf16 %v34_v29, %v753_v2  ;;  %v580_v36 = vpack.c.bf16 %v35_v30, %v748_v1  ;;  %v567_v37 = vpack.c.bf16 %v53_v32, %v43_v31 }
  0x7f   :  { %v659_v38 = vunpack.i.l.bf16 %v838_v33  ;;  %v654_v39 = vunpack.i.l.bf16 %v840_v34 }
  0x80   :  { %566 = vmatpush1.bf16.msra.mxu0 %v565_v35  ;;  %581 = vmatpush3.bf16.msra.mxu1 %v580_v36 }
  0x81   :  { %568 = vmatprep.subr.bf16.mxu0 %v567_v37  ;;  %582 = vmatprep.subr.bf16.mxu1 %v708_v3  ;;  %v44_v40 = vsel %vm42_vm2, %v654_v39, %v644_v21  ;;  %v54_v41 = vsel %vm52_vm3, %v659_v38, %v649_v27  ;;  %v45_v42 = vsel %vm42_vm2, %v645_v20, %v654_v39 }
  0x82   :  { %v61_v43 = vpop.permute.xlu1 %60  ;;  %v59_v44 = vpop.permute.xlu0 %58  ;;  %v569_v45 = vpack.c.bf16 %v54_v41, %v44_v40  ;;  %v55_v46 = vsel %vm52_vm3, %v650_v26, %v659_v38 }
  0x83   :  { %v583_v47 = vpack.c.bf16 %v55_v46, %v45_v42  ;;  %v860_v52 = vsel %vm62_vm4, %v59_v44, %v61_v43 }
  0x84   :  { %570 = vmatpush1.bf16.msra.mxu0 %v569_v45 }
  0x85   :  { %584 = vmatpush3.bf16.msra.mxu1 %v583_v47 }
  0x86   :  { %v57_v48 = vpop.permute.xlu1 %56  ;;  %v663_v49 = vpop.permute.xlu0 %662  ;;  %585 = vmatprep.subr.bf16.mxu1 %v708_v3 }
  0x87   :  { %v665_v50 = vunpack.i.h.bf16 %v663_v49  ;;  %v664_v51 = vunpack.i.l.bf16 %v663_v49  ;;  %v867_v57 = vsel %vm62_vm4, %v57_v48, %v59_v44  ;;  %v871_v58 = vsel %vm62_vm4, %v61_v43, %v57_v48 }
  0x88   :  { %v660_v44 = vunpack.i.h.bf16 %v838_v33 }
  0x89   :  { %v73_v53 = vsel %vm72_vm5, %v664_v51, %v665_v50 }
  0x8a   :  { %v668_v54 = vpop.permute.xlu1 %667  ;;  %v67_v55 = vpop.permute.xlu0 %66  ;;  %v571_v56 = vpack.c.bf16 %v73_v53, %v860_v52 }
  0x8b   :  { %v74_v59 = vsel %vm72_vm5, %v67_v55, %v664_v51  ;;  %v75_v60 = vsel %vm72_vm5, %v665_v50, %v67_v55  ;;  %v670_v63 = vunpack.i.h.bf16 %v668_v54  ;;  %v669_v0 = vunpack.i.l.bf16 %v668_v54 }
  0x8c   :  { %v573_v61 = vpack.c.bf16 %v74_v59, %v867_v57  ;;  %v586_v62 = vpack.c.bf16 %v75_v60, %v871_v58  ;;  %572 = vmatprep.subr.bf16.mxu0 %v571_v56 }
  0x8d   :  { %v83_v10 = vsel %vm82_vm6, %v669_v0, %v670_v63 }
  0x8e   :  { %v77_v1 = vpop.permute.xlu1 %76  ;;  %v673_v2 = vpop.permute.xlu0 %672  ;;  %574 = vmatpush1.bf16.msra.mxu0 %v573_v61  ;;  %587 = vmatpush3.bf16.msra.mxu1 %v586_v62 }
  0x8f   :  { %v675_v4 = vunpack.i.h.bf16 %v673_v2  ;;  %v674_v6 = vunpack.i.l.bf16 %v673_v2  ;;  %588 = vmatprep.subr.bf16.mxu1 %v708_v3  ;;  %v84_v16 = vsel %vm82_vm6, %v77_v1, %v669_v0  ;;  %v85_v17 = vsel %vm82_vm6, %v670_v63, %v77_v1 }
  0x91   :  { %v93_v11 = vsel %vm92_vm7, %v674_v6, %v675_v4 }
  0x92   :  { %v99_v12 = vpop.permute.xlu1 %98  ;;  %v87_v13 = vpop.permute.xlu0 %86  ;;  %v575_v14 = vpack.c.bf16 %v93_v11, %v83_v10 }
  0x93   :  { %v94_v18 = vsel %vm92_vm7, %v87_v13, %v674_v6  ;;  %v95_v19 = vsel %vm92_vm7, %v675_v4, %v87_v13 }
  0x94   :  { %v577_v20 = vpack.c.bf16 %v94_v18, %v84_v16  ;;  %v589_v21 = vpack.c.bf16 %v95_v19, %v85_v17  ;;  %576 = vmatprep.subr.bf16.mxu0 %v575_v14 }
  0x96   :  { %v678_v22 = vpop.permute.xlu1 %677  ;;  %v101_v23 = vpop.permute.xlu0 %100  ;;  %578 = vmatpush1.bf16.msra.mxu0 %v577_v20  ;;  %590 = vmatpush3.bf16.msra.mxu1 %v589_v21 }
  0x97   :  { %v680_v26 = vunpack.i.h.bf16 %v678_v22  ;;  %v679_v27 = vunpack.i.l.bf16 %v678_v22  ;;  %v103_v28 = vsel %vm102_vm8, %v99_v12, %v101_v23  ;;  %537 = vmatprep.subr.mxu1 %v716_v9 }
  0x98   :  { %126 = vmatprep.subr.mxu0 %v103_v28 }
  0x99   :  { %v272_v29 = vsel %vm32_vm1, %v679_v27, %v680_v26  ;;  %v270_v30 = vsel %vm32_vm1, %v640_v25, %v679_v27  ;;  %v271_v31 = vsel %vm32_vm1, %v680_v26, %v640_v25 }
  0x9a   :  { %v683_v32 = vpop.permute.xlu1 %682  ;;  %v97_v35 = vpop.permute.xlu0 %96  ;;  %v591_v36 = vpack.c.bf16 %v270_v30, %v761_v5  ;;  %v608_v37 = vpack.c.bf16 %v272_v29, %v787_v8  ;;  %v593_v41 = vpack.c.bf16 %v271_v31, %v782_v7  ;;  %v655_v5 = vunpack.i.h.bf16 %v840_v34 }
  0x9b   :  { %v104_v38 = vsel %vm102_vm8, %v97_v35, %v99_v12  ;;  %v105_v39 = vsel %vm102_vm8, %v101_v23, %v97_v35  ;;  %v685_v40 = vunpack.i.h.bf16 %v683_v32  ;;  %v684_v42 = vunpack.i.l.bf16 %v683_v32 }
  0x9c   :  { %127 = vmatpush1.msra.mxu0 %v104_v38  ;;  %538 = vmatpush3.msra.mxu1 %v105_v39 }
  0x9d   :  { %491 = vmatmul.mubr.msk.f32.vlgmr.msra.gmra.mrb[0].mxu0 %vm106_vm9, %v908_v24  ;;  %540 = vmatmul.mubr.msk.f32.vlgmr.msra.gmra.mrb[0].mxu1 %vm106_vm9, %v908_v24  ;;  %v280_v7 = vsel %vm42_vm2, %v685_v40, %v655_v5  ;;  %v281_v47 = vsel %vm42_vm2, %v684_v42, %v685_v40  ;;  %v279_v48 = vsel %vm42_vm2, %v655_v5, %v684_v42 }
  0x9e   :  { %592 = vmatprep.subr.bf16.mxu0 %v591_v36  ;;  %607 = vmatprep.subr.bf16.mxu1 %v708_v3  ;;  %v294_v8 = vpop.permute.xlu1 %293  ;;  %v688_v43 = vpop.permute.xlu0 %687 }
  0x9f   :  { %v690_v45 = vunpack.i.h.bf16 %v688_v43  ;;  %v689_v46 = vunpack.i.l.bf16 %v688_v43  ;;  %594 = vmatpush1.bf16.msra.mxu0 %v593_v41  ;;  %609 = vmatpush3.bf16.msra.mxu1 %v608_v37 }
  0xa0   :  { %610 = vmatprep.subr.bf16.mxu1 %v708_v3  ;;  %400 = vmatprep.mubr.f32.mxu0 %v716_v9 }
  0xa1   :  { %v289_v34 = vsel %vm52_vm3, %v690_v45, %v660_v44  ;;  %v290_v33 = vsel %vm52_vm3, %v689_v46, %v690_v45  ;;  %v288_v49 = vsel %vm52_vm3, %v660_v44, %v689_v46  ;;  %560 = vmatprep.mubr.msk.f32.mxu1 %vm717_vm0, %v716_v9 }
  0xa2   :  { %v597_v50 = vpack.c.bf16 %v289_v34, %v280_v7  ;;  %v611_v51 = vpack.c.bf16 %v290_v33, %v281_v47  ;;  %v693_v53 = vpop.permute.xlu1 %692  ;;  %v296_v54 = vpop.permute.xlu0 %295  ;;  %v595_v55 = vpack.c.bf16 %v288_v49, %v279_v48 }
  0xa3   :  { %v695_v56 = vunpack.i.h.bf16 %v693_v53  ;;  %v694_v59 = vunpack.i.l.bf16 %v693_v53  ;;  %v944_v61 = vsel %vm62_vm4, %v294_v8, %v296_v54 }
  0xa4   :  { %596 = vmatprep.subr.bf16.mxu0 %v595_v55  ;;  %612 = vmatpush3.bf16.msra.mxu1 %v611_v51 }
  0xa5   :  { %v306_v60 = vsel %vm72_vm5, %v694_v59, %v695_v56  ;;  %598 = vmatpush1.bf16.msra.mxu0 %v597_v50  ;;  %613 = vmatprep.subr.bf16.mxu1 %v708_v3 }
  0xa6   :  { %v599_v62 = vpack.c.bf16 %v306_v60, %v944_v61  ;;  %v301_v63 = vpop.permute.xlu1 %300  ;;  %v292_v0 = vpop.permute.xlu0 %291 }
  0xa7   :  { %v307_v1 = vsel %vm72_vm5, %v301_v63, %v694_v59  ;;  %v308_v2 = vsel %vm72_vm5, %v695_v56, %v301_v63  ;;  %v298_v4 = vsel %vm62_vm4, %v292_v0, %v294_v8  ;;  %v299_v6 = vsel %vm62_vm4, %v296_v54, %v292_v0 }
  0xa8   :  { %v601_v10 = vpack.c.bf16 %v307_v1, %v298_v4  ;;  %v614_v11 = vpack.c.bf16 %v308_v2, %v299_v6  ;;  %600 = vmatprep.subr.bf16.mxu0 %v599_v62 }
  0xaa   :  { %v703_v12 = vpop.permute.xlu1 %702  ;;  %v698_v13 = vpop.permute.xlu0 %697  ;;  %602 = vmatpush1.bf16.msra.mxu0 %v601_v10  ;;  %615 = vmatpush3.bf16.msra.mxu1 %v614_v11 }
  0xab   :  { %v705_v14 = vunpack.i.h.bf16 %v703_v12  ;;  %v704_v16 = vunpack.i.l.bf16 %v703_v12  ;;  %v700_v17 = vunpack.i.h.bf16 %v698_v13  ;;  %v699_v18 = vunpack.i.l.bf16 %v698_v13  ;;  %616 = vmatprep.subr.bf16.mxu1 %v708_v3 }
  0xad   :  { %v315_v19 = vsel %vm82_vm6, %v699_v18, %v700_v17  ;;  %v324_v20 = vsel %vm92_vm7, %v704_v16, %v705_v14 }
  0xae   :  { %v319_v21 = vpop.permute.xlu1 %318  ;;  %v310_v22 = vpop.permute.xlu0 %309  ;;  %v603_v23 = vpack.c.bf16 %v324_v20, %v315_v19 }
  0xaf   :  { %v325_v25 = vsel %vm92_vm7, %v319_v21, %v704_v16  ;;  %v326_v26 = vsel %vm92_vm7, %v705_v14, %v319_v21  ;;  %v316_v27 = vsel %vm82_vm6, %v310_v22, %v699_v18  ;;  %v317_v3 = vsel %vm82_vm6, %v700_v17, %v310_v22 }
  0xb0   :  { %v605_v28 = vpack.c.bf16 %v325_v25, %v316_v27  ;;  %v617_v29 = vpack.c.bf16 %v326_v26, %v317_v3  ;;  %604 = vmatprep.subr.bf16.mxu0 %v603_v23 }
  0xb2   :  { %v332_v30 = vpop.permute.xlu1 %331  ;;  %v330_v31 = vpop.permute.xlu0 %329  ;;  %606 = vmatpush1.bf16.msra.mxu0 %v605_v28  ;;  %618 = vmatpush3.bf16.msra.mxu1 %v617_v29 }
  0xb3   :  { %v333_v32 = vsel %vm102_vm8, %v330_v31, %v332_v30  ;;  %558 = vmatprep.subr.mxu1 %v716_v9 }
  0xb4   :  { %352 = vmatprep.subr.mxu0 %v333_v32 }
  0xb6   :  { %v328_v35 = vpop.permute.xlu0 %327 }
  0xb7   :  { %v334_v36 = vsel %vm102_vm8, %v328_v35, %v330_v31  ;;  %v335_v37 = vsel %vm102_vm8, %v332_v30, %v328_v35 }
  0xb8   :  { %353 = vmatpush1.msra.mxu0 %v334_v36  ;;  %559 = vmatpush3.msra.mxu1 %v335_v37 }
  0xb9   :  { %496 = vmatmul.mubr.msk.f32.vlgmr.msra.gmra.mrb[2].mxu0 %vm106_vm9, %v908_v24  ;;  %561 = vmatmul.mubr.msk.f32.vlgmr.msra.gmra.mrb[2].mxu1 %vm106_vm9, %v908_v24 }
  0xc3   :  { %v19_v38 = vpop.permute.xlu1 %18 }
 0x170   :  { %v176_v39 = vpop.f32.mrb[0].mxu0  ;;  %v247_v40 = vpop.f32.mrb[0].mxu1 }
 0x171   :  { %v251_v9 = vadd.f32 %v176_v39, %v867_v57  ;;  %v253_v41 = vadd.f32 %v247_v40, %v871_v58  ;;  %v178_v42 = vpop.f32.mrb[1].mxu0  ;;  %v541_v5 = vpop.f32.mrb[1].mxu1 }
 0x172   :  { %v252_v15 = vadd.f32 %v178_v42, %v860_v52 }
 0x173   :  { %v254_v8 = vadd.f32 %v251_v9, %v19_v38  ;;  %v256_v43 = vadd.f32 %v253_v41, %v19_v38 }
 0x174   :  { %v255_v44 = vadd.f32 %v252_v15, %v19_v38 }
 0x175   :  { %257 = vst [vmem:[%s1005_s3] sm:$0xff] %v254_v8  ;;  %259 = vst [vmem:[%s1005_s3 + $0x10] sm:$0xff] %v256_v43 }
 0x176   :  { %258 = vst [vmem:[%s1005_s3 + $0x8] sm:$0xff] %v255_v44 }
 0x18c   :  { %v402_v57 = vpop.f32.mrb[2].mxu0  ;;  %v473_v58 = vpop.f32.mrb[2].mxu1 }
 0x18d   :  { %v477_v24 = vadd.f32 %v402_v57, %v298_v4  ;;  %v479_v45 = vadd.f32 %v473_v58, %v299_v6  ;;  %v404_v52 = vpop.f32.mrb[3].mxu0  ;;  %v562_v46 = vpop.f32.mrb[3].mxu1 }
 0x18e   :  { %v478_v7 = vadd.f32 %v404_v52, %v944_v61 }
 0x18f   :  { %v480_v47 = vadd.f32 %v477_v24, %v19_v38  ;;  %v482_v34 = vadd.f32 %v479_v45, %v19_v38 }
 0x190   :  { %v481_v33 = vadd.f32 %v478_v7, %v19_v38 }
 0x191   :  { %498 = vst [vmem:[%s1005_s3 + $0x18] sm:$0xff] %v480_v47  ;;  %500 = vst [vmem:[%s1005_s3 + $0x28] sm:$0xff] %v482_v34 }
 0x192   :  { %499 = vst [vmem:[%s1005_s3 + $0x20] sm:$0xff] %v481_v33 }

</bundles_post_ra>
